<compile_context>
chip_gen: v6e
topology: v6e:2x2x1
jax: 0.10.0
libtpu: 0.0.40
codegen_flags: <defaults>
</compile_context>

<pallas_src>
import jax
import jax.numpy as jnp
from jax import lax
from jax.experimental import pallas as pl
from jax.experimental.pallas import tpu as pltpu


def _lr_probe_kernel(x_ref, w_ref, o_ref):
    # x_ref: (tile_b, d_in), w_ref: (1, d_in) lane-dense, o_ref: (1, tile_b) lane-dense f32
    logits = lax.dot_general(
        w_ref[...], x_ref[...],
        dimension_numbers=(((1,), (1,)), ((), ())),   # contract on d_in -> (1, tile_b)
        preferred_element_type=jnp.float32,           # f32 accumulation on the MXU
    )
    o_ref[...] = jax.nn.sigmoid(logits).astype(o_ref.dtype)


def _vmem_limits():
    """Generation-dependent (vmem_capacity, vmem_limit_bytes, per-x-buffer budget)."""
    cap = None
    try:
        cap = getattr(pltpu.get_tpu_info(), "vmem_capacity_bytes", None)
    except Exception:
        cap = None
    if not cap:
        cap = 64 * 1024 * 1024                         # conservative default (v7x-sized)
    vmem_limit = int(cap * 0.8)                        # ~51 MiB on v7x, ~102 MiB on v5e/v6e
    reserve = 8 * 1024 * 1024                          # weight + output blocks + compiler scratch
    x_buf_budget = max(4 * 1024 * 1024, (vmem_limit - reserve) // 2)   # double-buffered x
    return cap, vmem_limit, x_buf_budget


def _choose_tile_b(B, d_in, dtype, vmem_cap, x_buf_budget):
    """Pick a batch tile (multiple of 128, or the whole batch) sized by *physical* VMEM bytes."""
    if B <= 256:
        return B                                       # single block; latency-dominated anyway

    itemsize = jnp.dtype(dtype).itemsize
    lanes = pl.cdiv(d_in, 128) * 128                   # lane dim pads to 128 in VMEM
    bytes_per_row = lanes * itemsize                   # rows are multiples of 128, so the
                                                       # sublane tile (8/16/32) is satisfied
    tile_b = max(128, (x_buf_budget // bytes_per_row) // 128 * 128)

    if vmem_cap <= 96 * 1024 * 1024:
        # v7x-class (2 TensorCores share the grid): aim for >=4 grid steps so both cores get
        # work, but never shrink a tile below ~2 MiB of physical VMEM.
        # TODO(synk): if tiles end up small here, sweep pipeline_mode=pl.Buffered(3) on the
        # x BlockSpec to keep the 3.2 TB/s HBM pipe full.
        quarter = pl.cdiv(pl.cdiv(B, 4), 128) * 128
        floor_rows = max(128, ((2 * 1024 * 1024) // bytes_per_row) // 128 * 128)
        tile_b = min(tile_b, max(quarter, floor_rows))

    return B if tile_b >= B else tile_b


def lr_probe_forward(x, w, *, tile_b=None):
    """LRProbe forward pass: sigmoid(x @ w.T).squeeze(-1).

    x: (B, d_in); w: (1, d_in)  (torch Linear(d_in, 1, bias=False).weight layout).
    x may be f32 or bf16 (bf16 halves HBM traffic); accumulation is f32 and the returned
    probabilities are f32 of shape (B,).
    """
    B, d_in = x.shape
    assert w.shape == (1, d_in), "weight must be (1, d_in) (torch Linear weight layout)"

    vmem_cap, vmem_limit, x_buf_budget = _vmem_limits()

    if tile_b is None:
        tile_b = _choose_tile_b(B, d_in, x.dtype, vmem_cap, x_buf_budget)
    else:
        # Validate/normalize user-supplied tile_b: output blocks must be lane-dense
        # (multiple of 128) unless a single block covers the whole batch.
        tile_b = int(tile_b)
        if tile_b < B:
            tile_b = max(128, pl.cdiv(tile_b, 128) * 128)
        if tile_b >= B:
            tile_b = B

    num_tiles = pl.cdiv(B, tile_b)   # ragged batches: last block is partial, clipped by Pallas

    out = pl.pallas_call(
        _lr_probe_kernel,
        out_shape=jax.ShapeDtypeStruct((1, B), jnp.float32),
        grid_spec=pltpu.PrefetchScalarGridSpec(
            num_scalar_prefetch=0,
            grid=(num_tiles,),
            in_specs=[
                pl.BlockSpec((tile_b, d_in), lambda i: (i, 0)),  # streamed batch tile of x
                pl.BlockSpec((1, d_in), lambda i: (0, 0)),       # lane-dense weight, resident
            ],
            out_specs=pl.BlockSpec((1, tile_b), lambda i: (0, i)),  # lane-dense logits slab
        ),
        compiler_params=pltpu.CompilerParams(
            dimension_semantics=("parallel",),   # megacore/v7x: shard batch tiles across TCs
            vmem_limit_bytes=vmem_limit,
        ),
    )(x, w)

    # glue: squeeze(-1) semantics of the PyTorch forward
    return out[0]


def lr_probe_ref(x, w):
    return jax.nn.sigmoid(x.astype(jnp.float32) @ w[0].astype(jnp.float32))


# TODO(synk): LRProbe.from_data (AdamW + BCELoss training loop) and .pred (round) are
# host-side training / post-processing, not part of the forward pass; not kernelized.

if __name__ == "__main__":
    key = jax.random.PRNGKey(0)
    kx, kw, kx2 = jax.random.split(key, 3)

    # Small shapes implied by the module: (batch, hidden).
    B, d_in = 16, 32
    x = jax.random.normal(kx, (B, d_in), dtype=jnp.float32)
    # torch Linear(d_in, 1, bias=False).weight has shape (1, d_in); keep it lane-dense.
    w = jax.random.normal(kw, (1, d_in), dtype=jnp.float32) * (1.0 / jnp.sqrt(d_in))

    y = lr_probe_forward(x, w)
    jax.block_until_ready(y)
    assert y.shape == (B,)
    assert y.dtype == jnp.float32
    assert jnp.allclose(y, lr_probe_ref(x, w), atol=1e-5, rtol=1e-5)

    # Multi-tile + ragged-batch path: 3 grid steps, partial last block, NO jnp.pad copy.
    B2 = 300
    x2 = jax.random.normal(kx2, (B2, d_in), dtype=jnp.float32)
    y2 = lr_probe_forward(x2, w, tile_b=128)
    jax.block_until_ready(y2)
    assert y2.shape == (B2,)
    assert jnp.allclose(y2, lr_probe_ref(x2, w), atol=1e-5, rtol=1e-5)

    # Auto tile selection on the same ragged batch (single clipped block).
    y3 = lr_probe_forward(x2, w)
    jax.block_until_ready(y3)
    assert y3.shape == (B2,)
    assert jnp.allclose(y3, lr_probe_ref(x2, w), atol=1e-5, rtol=1e-5)

    print("KERNEL_OK")
</pallas_src>

<mosaic_0001>
module attributes {stable_mosaic.version = 11 : i64} {
  func.func @_lr_probe_kernel(%arg0: i32, %arg1: memref<16x32xf32, #tpu.memory_space<vmem>>, %arg2: memref<1x32xf32, #tpu.memory_space<vmem>>, %arg3: memref<1x16xf32, #tpu.memory_space<vmem>>) attributes {dimension_semantics = [#tpu.dimension_semantics<parallel>], iteration_bounds = array<i64: 1>, scalar_prefetch = 0 : i64, scratch_operands = 0 : i64, tpu.core_type = #tpu.core_type<tc>, window_params = [{transform_indices = @transform_0, window_bounds = array<i64: 16, 32>}, {pipeline_mode = #tpu.pipeline_mode<synchronous>, transform_indices = @transform_1, window_bounds = array<i64: 1, 32>}, {transform_indices = @transform_2, window_bounds = array<i64: 1, 16>}]} {
    %c0 = arith.constant 0 : index
    %c0_0 = arith.constant 0 : index
    %0 = vector.load %arg2[%c0, %c0_0] : memref<1x32xf32, #tpu.memory_space<vmem>>, vector<1x32xf32>
    %c0_1 = arith.constant 0 : index
    %c0_2 = arith.constant 0 : index
    %1 = vector.load %arg1[%c0_1, %c0_2] : memref<16x32xf32, #tpu.memory_space<vmem>>, vector<16x32xf32>
    %cst = arith.constant dense<0.000000e+00> : vector<1x16xf32>
    %2 = tpu.matmul %0, %1, %cst {dimension_numbers = #tpu.dot_dimension_numbers<[1], [1], [0], [0], [0, 0, 1, 0], [], []>} : vector<1x32xf32>, vector<16x32xf32>, vector<1x16xf32> -> vector<1x16xf32>
    %3 = arith.negf %2 : vector<1x16xf32>
    %4 = math.exp %3 : vector<1x16xf32>
    %cst_3 = arith.constant 1.000000e+00 : f32
    %5 = vector.broadcast %cst_3 : f32 to vector<1x16xf32>
    %6 = arith.addf %5, %4 : vector<1x16xf32>
    %7 = arith.divf %5, %6 : vector<1x16xf32>
    %c0_4 = arith.constant 0 : index
    %c0_5 = arith.constant 0 : index
    %8 = vector.load %arg3[%c0_4, %c0_5] : memref<1x16xf32, #tpu.memory_space<vmem>>, vector<1x16xf32>
    tpu.vector_store %arg3[%c0_4, %c0_5], %7 {strides = array<i32>} : memref<1x16xf32, #tpu.memory_space<vmem>>, vector<1x16xf32>,
    return
  }
  func.func @transform_0(%arg0: i32) -> (i32, i32) {
    %c0_i32 = arith.constant 0 : i32
    %c0_i32_0 = arith.constant 0 : i32
    return %arg0, %c0_i32 : i32, i32
  }
  func.func @transform_1(%arg0: i32) -> (i32, i32) {
    %c0_i32 = arith.constant 0 : i32
    %c0_i32_0 = arith.constant 0 : i32
    %c0_i32_1 = arith.constant 0 : i32
    return %c0_i32, %c0_i32_0 : i32, i32
  }
  func.func @transform_2(%arg0: i32) -> (i32, i32) {
    %c0_i32 = arith.constant 0 : i32
    %c0_i32_0 = arith.constant 0 : i32
    return %c0_i32, %arg0 : i32, i32
  }
}

</mosaic_0001>

<bundles_post_ra>
// kernel: tpu_custom_call.1
= control target key start
LH: loop header
LB: loop body
LE: loop exit
PB: predicated region body
PF: predicated region fallthrough
CT: control target
= control target key end

     0   :  { %7 = vsyncpa [#allocation3], 0  ;;  %s230_s0 = inlined_call_operand.hbm [shape: f32[16,32], index: 0, kind: input, shape index: {}]   ;;  %s231_s1 = inlined_call_operand.vmem [shape: f32[1,32], index: 1, kind: input, shape index: {}]   ;;  %s232_s2 = inlined_call_operand.hbm [shape: f32[1,16], index: 2, kind: output, shape index: {}]  }
   0x1   :  { %8 = vsyncpa [#allocation4], 0  ;;  %s200_s9 = smov [#allocation2]  }
   0x2   :  { %s14_s10 = sshll.u32 %s200_s9, 4  ;;  %s15_s10 = int_to_ptr.vmem [resolvable:$true] %s14_s10 }
   0x3   :  { %s164_s11 = scalar_lea.vmem %s15_s10, 256  ;;  %p169_p1 = scmp.lt.s32.totalorder %s15_s10, %s15_s10 }
   0x4   :  { %p165_p0 = scmp.ne.s32.totalorder %s15_s10, %s164_s11  ;;  %p170_p2 = scmp.lt.s32.totalorder %s164_s11, %s164_s11 }
   0x6   :  { %p171_p3 = por %p170_p2, %p169_p1 }
   0x8   :  { %p172_p4 = pnand %p171_p3, %p165_p0 }
   0xa   :  { %175 = shalt.err (!%p172_p4)
}
   0xb   :  { %s201_s12 = smov 128   ;;  %s202_s13 = smov 8  }
   0xc   :  { %20 = dma.hbm_to_vmem [thread:$0]  %s230_s0, 256, %s15_s10, [#allocation3], %s201_s12, %s201_s12, %s202_s13  }
   0xd   :  { %196 = dma.done.wait [#allocation3], 256  }
   0xe   :  { %197 = vsyncadd [#allocation3], 4294967040  ;;  %v203_v0 = vmov 0.0   ;;  %vm204_vm0 = vmmov 0   ;;  %vm29_vm1 = vcmask 261120   ;;  %v28_v1 = vld [vmem:[#allocation2 + $0x8] sm:$0xff] }
   0xf   :  { %139 = vmatprep.subr.mxu0 %v203_v0  ;;  %143 = vmatprep.mubr.msk.f32.mxu0 %vm204_vm0, %v203_v0  ;;  %v27_v2 = vld [vmem:[#allocation2] sm:$0xff]  ;;  %s205_s0 = smov [#allocation5]   ;;  %vm115_vm2 = vcmask 122880  }
  0x10   :  { %140 = vmatpush3.xpose.msk.msra.mxu0 %vm29_vm1, %v28_v1  ;;  %v26_v3 = vld [vmem:[%s231_s1] sm:$0x1]  ;;  %s123_s18 = sshll.u32 %s205_s0, 4  ;;  %s124_s18 = int_to_ptr.vmem [resolvable:$true] %s123_s18 }
  0x11   :  { %141 = vmatprep.subr.mxu0 %v203_v0  ;;  %s176_s19 = scalar_lea.vmem %s124_s18, 16  ;;  %s180_s20 = scalar_lea.vmem %s124_s18, 32 }
  0x12   :  { %p177_p5 = scmp.ne.s32.totalorder %s124_s18, %s176_s19  ;;  %p181_p6 = scmp.lt.s32.totalorder %s124_s18, %s124_s18 }
  0x13   :  { %p182_p7 = scmp.lt.s32.totalorder %s180_s20, %s176_s19 }
  0x14   :  { %142 = vmatpush3.xpose.msk.msra.mxu0 %vm29_vm1, %v27_v2 }
  0x15   :  { %p183_p8 = por %p182_p7, %p181_p6 }
  0x17   :  { %144 = vmatmul.mubr.msk.f32.vlgmr.msra.gmra.mxu0 %vm29_vm1, %v26_v3  ;;  %p184_p9 = pnand %p183_p8, %p177_p5 }
  0xd7   :  { %v105_v4 = vpop.f32.mrf.mxu0 }
  0xd8   :  { %v135_v5 = vmul.f32 -1.442695, %v105_v4 }
  0xd9   :  { %v145_v6 = vpop.f32.mrf.mxu0 }
  0xda   :  { %152 = vpow2.f32 %v135_v5 }
  0xe7   :  { %v153_v7 = vpop.eup %152 }
  0xe8   :  { %v112_v8 = vadd.f32 1.0, %v153_v7 }
  0xea   :  { %154 = vrcp.f32 %v112_v8 }
  0xf7   :  { %v155_v9 = vpop.eup %154 }
  0xf8   :  { %116 = vst.msk [vmem:[#allocation5] sm:$0x1] %vm115_vm2, %v155_v9 }
  0xf9   :  { %187 = shalt.err (!%p184_p9)
}
  0xfa   :  { %126 = dma.vmem_to_hbm [thread:$0]  %s124_s18, 16, %s232_s2, [#allocation4]  }
  0xfb   :  { %198 = dma.done.wait [#allocation4], 16  }
  0xfc   :  { %199 = vsyncadd [#allocation4], 4294967280 }
  0xfd   :  { %130 = vsyncpa [#allocation3], 1 }
  0xfe   :  { %131 = vsyncpa [#allocation4], 1 }

</bundles_post_ra>
